<compile_context>
chip_gen: v7x
topology: tpu7x:2x2x1
jax: 0.10.0
libtpu: 0.0.40
codegen_flags: <defaults>
</compile_context>

<pallas_src>
import jax
import jax.numpy as jnp
from jax.experimental import pallas as pl
from jax.experimental.pallas import tpu as pltpu


EMBEDDING_DIM = 128
HIDDEN_LAYERS = [256, 128, 64]


def _round_up(x, m):
    return ((x + m - 1) // m) * m


def _mlp_kernel(xu_ref, xv_ref,
                w1u_ref, w1v_ref, b1_ref,
                w2_ref, b2_ref,
                w3_ref, b3_ref,
                wo_ref, bo_ref,
                out_ref):
    """Fused MLP for one batch tile.

    xu_ref/xv_ref : [TB, 128] bf16   (user / video embeddings)
    w1u/w1v       : [128, 256] bf16, b1: [1, 256] f32
    w2            : [256, 128] bf16, b2: [1, 128] f32
    w3            : [128, 128] bf16 (64 real cols, zero-padded), b3: [1, 128] f32
    wo            : [1, 128]  f32  (64 real cols, zero-padded), bo: [1, 1] f32
    out_ref       : [TB, 1]   f32
    """
    # Layer 1: split-K dot (replaces concat + single 256-wide dot).
    h = (jnp.dot(xu_ref[...], w1u_ref[...], preferred_element_type=jnp.float32)
         + jnp.dot(xv_ref[...], w1v_ref[...], preferred_element_type=jnp.float32)
         + b1_ref[...])
    h = jnp.maximum(h, 0.0).astype(jnp.bfloat16)

    # Layer 2
    h = jnp.dot(h, w2_ref[...], preferred_element_type=jnp.float32) + b2_ref[...]
    h = jnp.maximum(h, 0.0).astype(jnp.bfloat16)

    # Layer 3 (lane-padded to 128; padded cols are exactly 0 after ReLU)
    h = jnp.dot(h, w3_ref[...], preferred_element_type=jnp.float32) + b3_ref[...]
    h = jnp.maximum(h, 0.0)

    # Output layer as VPU multiply + lane reduce (avoids an N=1 MXU matmul).
    logit = jnp.sum(h * wo_ref[...], axis=-1, keepdims=True) + bo_ref[...]
    out_ref[...] = jax.nn.sigmoid(logit).astype(out_ref.dtype)


def init_params(key, num_users, num_videos,
                embedding_dim=EMBEDDING_DIM, hidden_layers=HIDDEN_LAYERS):
    """Deterministic synthetic parameters (shapes match the PyTorch module)."""
    keys = jax.random.split(key, 8)
    params = {}
    params["user_embedding"] = (
        jax.random.normal(keys[0], (num_users, embedding_dim), jnp.float32) * 0.05)
    params["video_embedding"] = (
        jax.random.normal(keys[1], (num_videos, embedding_dim), jnp.float32) * 0.05)

    dims = [embedding_dim * 2] + list(hidden_layers)
    dense = []
    for i in range(len(hidden_layers)):
        fan_in, fan_out = dims[i], dims[i + 1]
        w = jax.random.normal(keys[2 + i], (fan_in, fan_out), jnp.float32) * (
            1.0 / jnp.sqrt(float(fan_in)))
        b = jnp.zeros((1, fan_out), jnp.float32)
        dense.append((w, b))
    params["dense"] = dense

    fan_in = hidden_layers[-1]
    params["out_w"] = jax.random.normal(keys[5], (fan_in, 1), jnp.float32) * (
        1.0 / jnp.sqrt(float(fan_in)))
    params["out_b"] = jnp.zeros((1, 1), jnp.float32)
    return params


def video_recommender_forward(params, user_ids, video_ids):
    """Mirrors VideoRecommenderDNN.forward (inference).

    user_ids, video_ids: int32 [B, 1]  (PyTorch path: embed -> squeeze(1))
    Returns: float32 [B, 1] prediction in (0, 1).
    """
    E = EMBEDDING_DIM

    # --- glue: embedding gather (plain JAX). No concat: keep two [B, E] inputs.
    user_emb = jnp.take(params["user_embedding"], user_ids[:, 0], axis=0)    # [B, E]
    video_emb = jnp.take(params["video_embedding"], video_ids[:, 0], axis=0)  # [B, E]

    B = user_emb.shape[0]
    TB = min(512, _round_up(B, 8))          # batch tile (sublane multiple of 8)
    B_pad = _round_up(B, TB)
    if B_pad != B:
        pad = B_pad - B
        user_emb = jnp.pad(user_emb, ((0, pad), (0, 0)))
        video_emb = jnp.pad(video_emb, ((0, pad), (0, 0)))

    xu = user_emb.astype(jnp.bfloat16)
    xv = video_emb.astype(jnp.bfloat16)

    # --- weight prep: bf16, split w1, lane-pad layer-3 / output to 128 ---
    (w1, b1), (w2, b2), (w3, b3) = params["dense"]
    wo, bo = params["out_w"], params["out_b"]

    w1_u = w1[:E, :].astype(jnp.bfloat16)                     # [128, 256]
    w1_v = w1[E:, :].astype(jnp.bfloat16)                     # [128, 256]
    b1f = b1.astype(jnp.float32)                              # [1, 256]
    w2b = w2.astype(jnp.bfloat16)                             # [256, 128]
    b2f = b2.astype(jnp.float32)                              # [1, 128]

    H3 = w3.shape[1]                                          # 64
    H3p = _round_up(H3, 128)                                  # 128 (lane-dense)
    w3p = jnp.zeros((w3.shape[0], H3p), jnp.bfloat16).at[:, :H3].set(
        w3.astype(jnp.bfloat16))                              # [128, 128]
    b3p = jnp.zeros((1, H3p), jnp.float32).at[:, :H3].set(b3)  # [1, 128]
    wop = jnp.zeros((1, H3p), jnp.float32).at[:, :H3].set(
        wo[:, 0][None, :].astype(jnp.float32))                # [1, 128]
    bof = bo.astype(jnp.float32)                              # [1, 1]

    grid = (pl.cdiv(B_pad, TB),)

    def tiled(shape):
        return pl.BlockSpec(shape, lambda i: (i, 0))

    def resident(shape):
        return pl.BlockSpec(shape, lambda i: (0, 0))

    out = pl.pallas_call(
        _mlp_kernel,
        out_shape=jax.ShapeDtypeStruct((B_pad, 1), jnp.float32),
        grid=grid,
        in_specs=[
            tiled((TB, E)),            # xu
            tiled((TB, E)),            # xv
            resident((E, 256)),        # w1_u
            resident((E, 256)),        # w1_v
            resident((1, 256)),        # b1
            resident((256, 128)),      # w2
            resident((1, 128)),        # b2
            resident((128, H3p)),      # w3 (padded)
            resident((1, H3p)),        # b3 (padded)
            resident((1, H3p)),        # wo row (padded)
            resident((1, 1)),          # bo
        ],
        out_specs=tiled((TB, 1)),
        compiler_params=pltpu.CompilerParams(
            dimension_semantics=("parallel",)),
    )(xu, xv, w1_u, w1_v, b1f, w2b, b2f, w3p, b3p, wop, bof)

    return out[:B]


def _reference_forward(params, user_ids, video_ids):
    """Pure-JAX f32 reference for correctness checking."""
    user_emb = jnp.take(params["user_embedding"], user_ids[:, 0], axis=0)
    video_emb = jnp.take(params["video_embedding"], video_ids[:, 0], axis=0)
    h = jnp.concatenate([user_emb, video_emb], axis=1)
    for w, b in params["dense"]:
        h = jnp.maximum(h @ w + b, 0.0)
    logit = h @ params["out_w"] + params["out_b"]
    return jax.nn.sigmoid(logit)


if __name__ == "__main__":
    key = jax.random.PRNGKey(0)
    num_users, num_videos = 100, 50
    batch = 8

    params = init_params(key, num_users, num_videos)

    k_u, k_v = jax.random.split(jax.random.PRNGKey(1))
    user_ids = jax.random.randint(k_u, (batch, 1), 0, num_users, dtype=jnp.int32)
    video_ids = jax.random.randint(k_v, (batch, 1), 0, num_videos, dtype=jnp.int32)

    fwd = jax.jit(video_recommender_forward)
    pred = fwd(params, user_ids, video_ids)
    pred = jax.block_until_ready(pred)

    ref = _reference_forward(params, user_ids, video_ids)
    assert pred.shape == (batch, 1), pred.shape
    # bf16 weights/activations: relaxed tolerance vs the f32 reference.
    assert jnp.allclose(pred, ref, atol=2e-2, rtol=2e-2), (pred, ref)

    print("KERNEL_OK")
</pallas_src>

<mosaic_0001>
module attributes {stable_mosaic.version = 11 : i64} {
  func.func @_mlp_kernel(%arg0: i32, %arg1: memref<8x128xbf16, #tpu.memory_space<vmem>>, %arg2: memref<8x128xbf16, #tpu.memory_space<vmem>>, %arg3: memref<128x256xbf16, #tpu.memory_space<vmem>>, %arg4: memref<128x256xbf16, #tpu.memory_space<vmem>>, %arg5: memref<1x256xf32, #tpu.memory_space<vmem>>, %arg6: memref<256x128xbf16, #tpu.memory_space<vmem>>, %arg7: memref<1x128xf32, #tpu.memory_space<vmem>>, %arg8: memref<128x128xbf16, #tpu.memory_space<vmem>>, %arg9: memref<1x128xf32, #tpu.memory_space<vmem>>, %arg10: memref<1x128xf32, #tpu.memory_space<vmem>>, %arg11: memref<1x1xf32, #tpu.memory_space<vmem>>, %arg12: memref<8x1xf32, #tpu.memory_space<vmem>>) attributes {dimension_semantics = [#tpu.dimension_semantics<parallel>], iteration_bounds = array<i64: 1>, scalar_prefetch = 0 : i64, scratch_operands = 0 : i64, tpu.core_type = #tpu.core_type<tc>, window_params = [{transform_indices = @transform_0, window_bounds = array<i64: 8, 128>}, {transform_indices = @transform_1, window_bounds = array<i64: 8, 128>}, {pipeline_mode = #tpu.pipeline_mode<synchronous>, transform_indices = @transform_2, window_bounds = array<i64: 128, 256>}, {pipeline_mode = #tpu.pipeline_mode<synchronous>, transform_indices = @transform_3, window_bounds = array<i64: 128, 256>}, {pipeline_mode = #tpu.pipeline_mode<synchronous>, transform_indices = @transform_4, window_bounds = array<i64: 1, 256>}, {pipeline_mode = #tpu.pipeline_mode<synchronous>, transform_indices = @transform_5, window_bounds = array<i64: 256, 128>}, {pipeline_mode = #tpu.pipeline_mode<synchronous>, transform_indices = @transform_6, window_bounds = array<i64: 1, 128>}, {pipeline_mode = #tpu.pipeline_mode<synchronous>, transform_indices = @transform_7, window_bounds = array<i64: 128, 128>}, {pipeline_mode = #tpu.pipeline_mode<synchronous>, transform_indices = @transform_8, window_bounds = array<i64: 1, 128>}, {pipeline_mode = #tpu.pipeline_mode<synchronous>, transform_indices = @transform_9, window_bounds = array<i64: 1, 128>}, {pipeline_mode = #tpu.pipeline_mode<synchronous>, transform_indices = @transform_10, window_bounds = array<i64: 1, 1>}, {transform_indices = @transform_11, window_bounds = array<i64: 8, 1>}]} {
    %c0 = arith.constant 0 : index
    %c0_0 = arith.constant 0 : index
    %0 = vector.load %arg1[%c0, %c0_0] : memref<8x128xbf16, #tpu.memory_space<vmem>>, vector<8x128xbf16>
    %c0_1 = arith.constant 0 : index
    %c0_2 = arith.constant 0 : index
    %1 = vector.load %arg3[%c0_1, %c0_2] : memref<128x256xbf16, #tpu.memory_space<vmem>>, vector<128x256xbf16>
    %cst = arith.constant dense<0.000000e+00> : vector<8x256xf32>
    %2 = tpu.matmul %0, %1, %cst {dimension_numbers = #tpu.dot_dimension_numbers<[1], [0], [0], [1], [0, 0, 1, 1], [], []>} : vector<8x128xbf16>, vector<128x256xbf16>, vector<8x256xf32> -> vector<8x256xf32>
    %c0_3 = arith.constant 0 : index
    %c0_4 = arith.constant 0 : index
    %3 = vector.load %arg2[%c0_3, %c0_4] : memref<8x128xbf16, #tpu.memory_space<vmem>>, vector<8x128xbf16>
    %c0_5 = arith.constant 0 : index
    %c0_6 = arith.constant 0 : index
    %4 = vector.load %arg4[%c0_5, %c0_6] : memref<128x256xbf16, #tpu.memory_space<vmem>>, vector<128x256xbf16>
    %cst_7 = arith.constant dense<0.000000e+00> : vector<8x256xf32>
    %5 = tpu.matmul %3, %4, %cst_7 {dimension_numbers = #tpu.dot_dimension_numbers<[1], [0], [0], [1], [0, 0, 1, 1], [], []>} : vector<8x128xbf16>, vector<128x256xbf16>, vector<8x256xf32> -> vector<8x256xf32>
    %6 = arith.addf %2, %5 : vector<8x256xf32>
    %c0_8 = arith.constant 0 : index
    %c0_9 = arith.constant 0 : index
    %7 = vector.load %arg5[%c0_8, %c0_9] : memref<1x256xf32, #tpu.memory_space<vmem>>, vector<1x256xf32>
    %8 = vector.broadcast %7 : vector<1x256xf32> to vector<8x256xf32>
    %9 = arith.addf %6, %8 : vector<8x256xf32>
    %cst_10 = arith.constant 0.000000e+00 : f32
    %10 = vector.broadcast %cst_10 : f32 to vector<8x256xf32>
    %11 = arith.maximumf %9, %10 : vector<8x256xf32>
    %12 = arith.truncf %11 : vector<8x256xf32> to vector<8x256xbf16>
    %c0_11 = arith.constant 0 : index
    %c0_12 = arith.constant 0 : index
    %13 = vector.load %arg6[%c0_11, %c0_12] : memref<256x128xbf16, #tpu.memory_space<vmem>>, vector<256x128xbf16>
    %cst_13 = arith.constant dense<0.000000e+00> : vector<8x128xf32>
    %14 = tpu.matmul %12, %13, %cst_13 {dimension_numbers = #tpu.dot_dimension_numbers<[1], [0], [0], [1], [0, 0, 1, 1], [], []>} : vector<8x256xbf16>, vector<256x128xbf16>, vector<8x128xf32> -> vector<8x128xf32>
    %c0_14 = arith.constant 0 : index
    %c0_15 = arith.constant 0 : index
    %15 = vector.load %arg7[%c0_14, %c0_15] : memref<1x128xf32, #tpu.memory_space<vmem>>, vector<1x128xf32>
    %16 = vector.broadcast %15 : vector<1x128xf32> to vector<8x128xf32>
    %17 = arith.addf %14, %16 : vector<8x128xf32>
    %cst_16 = arith.constant 0.000000e+00 : f32
    %18 = vector.broadcast %cst_16 : f32 to vector<8x128xf32>
    %19 = arith.maximumf %17, %18 : vector<8x128xf32>
    %20 = arith.truncf %19 : vector<8x128xf32> to vector<8x128xbf16>
    %c0_17 = arith.constant 0 : index
    %c0_18 = arith.constant 0 : index
    %21 = vector.load %arg8[%c0_17, %c0_18] : memref<128x128xbf16, #tpu.memory_space<vmem>>, vector<128x128xbf16>
    %cst_19 = arith.constant dense<0.000000e+00> : vector<8x128xf32>
    %22 = tpu.matmul %20, %21, %cst_19 {dimension_numbers = #tpu.dot_dimension_numbers<[1], [0], [0], [1], [0, 0, 1, 1], [], []>} : vector<8x128xbf16>, vector<128x128xbf16>, vector<8x128xf32> -> vector<8x128xf32>
    %c0_20 = arith.constant 0 : index
    %c0_21 = arith.constant 0 : index
    %23 = vector.load %arg9[%c0_20, %c0_21] : memref<1x128xf32, #tpu.memory_space<vmem>>, vector<1x128xf32>
    %24 = vector.broadcast %23 : vector<1x128xf32> to vector<8x128xf32>
    %25 = arith.addf %22, %24 : vector<8x128xf32>
    %cst_22 = arith.constant 0.000000e+00 : f32
    %26 = vector.broadcast %cst_22 : f32 to vector<8x128xf32>
    %27 = arith.maximumf %25, %26 : vector<8x128xf32>
    %c0_23 = arith.constant 0 : index
    %c0_24 = arith.constant 0 : index
    %28 = vector.load %arg10[%c0_23, %c0_24] : memref<1x128xf32, #tpu.memory_space<vmem>>, vector<1x128xf32>
    %29 = vector.broadcast %28 : vector<1x128xf32> to vector<8x128xf32>
    %30 = arith.mulf %27, %29 : vector<8x128xf32>
    %cst_25 = arith.constant dense<0.000000e+00> : vector<8xf32>
    %31 = vector.multi_reduction <add>, %30, %cst_25 [1] : vector<8x128xf32> to vector<8xf32>
    %32 = vector.shape_cast %31 : vector<8xf32> to vector<8x1xf32>
    %c0_26 = arith.constant 0 : index
    %c0_27 = arith.constant 0 : index
    %33 = vector.load %arg11[%c0_26, %c0_27] : memref<1x1xf32, #tpu.memory_space<vmem>>, vector<1x1xf32>
    %34 = vector.broadcast %33 : vector<1x1xf32> to vector<8x1xf32>
    %35 = arith.addf %32, %34 : vector<8x1xf32>
    %36 = arith.negf %35 : vector<8x1xf32>
    %37 = math.exp %36 : vector<8x1xf32>
    %cst_28 = arith.constant 1.000000e+00 : f32
    %38 = vector.broadcast %cst_28 : f32 to vector<8x1xf32>
    %39 = arith.addf %38, %37 : vector<8x1xf32>
    %40 = arith.divf %38, %39 : vector<8x1xf32>
    %c0_29 = arith.constant 0 : index
    %c0_30 = arith.constant 0 : index
    %41 = vector.load %arg12[%c0_29, %c0_30] : memref<8x1xf32, #tpu.memory_space<vmem>>, vector<8x1xf32>
    tpu.vector_store %arg12[%c0_29, %c0_30], %40 {strides = array<i32>} : memref<8x1xf32, #tpu.memory_space<vmem>>, vector<8x1xf32>,
    return
  }
  func.func @transform_0(%arg0: i32) -> (i32, i32) {
    %c0_i32 = arith.constant 0 : i32
    %c0_i32_0 = arith.constant 0 : i32
    return %arg0, %c0_i32 : i32, i32
  }
  func.func @transform_1(%arg0: i32) -> (i32, i32) {
    %c0_i32 = arith.constant 0 : i32
    %c0_i32_0 = arith.constant 0 : i32
    return %arg0, %c0_i32 : i32, i32
  }
  func.func @transform_2(%arg0: i32) -> (i32, i32) {
    %c0_i32 = arith.constant 0 : i32
    %c0_i32_0 = arith.constant 0 : i32
    %c0_i32_1 = arith.constant 0 : i32
    return %c0_i32, %c0_i32_0 : i32, i32
  }
  func.func @transform_3(%arg0: i32) -> (i32, i32) {
    %c0_i32 = arith.constant 0 : i32
    %c0_i32_0 = arith.constant 0 : i32
    %c0_i32_1 = arith.constant 0 : i32
    return %c0_i32, %c0_i32_0 : i32, i32
  }
  func.func @transform_4(%arg0: i32) -> (i32, i32) {
    %c0_i32 = arith.constant 0 : i32
    %c0_i32_0 = arith.constant 0 : i32
    %c0_i32_1 = arith.constant 0 : i32
    return %c0_i32, %c0_i32_0 : i32, i32
  }
  func.func @transform_5(%arg0: i32) -> (i32, i32) {
    %c0_i32 = arith.constant 0 : i32
    %c0_i32_0 = arith.constant 0 : i32
    %c0_i32_1 = arith.constant 0 : i32
    return %c0_i32, %c0_i32_0 : i32, i32
  }
  func.func @transform_6(%arg0: i32) -> (i32, i32) {
    %c0_i32 = arith.constant 0 : i32
    %c0_i32_0 = arith.constant 0 : i32
    %c0_i32_1 = arith.constant 0 : i32
    return %c0_i32, %c0_i32_0 : i32, i32
  }
  func.func @transform_7(%arg0: i32) -> (i32, i32) {
    %c0_i32 = arith.constant 0 : i32
    %c0_i32_0 = arith.constant 0 : i32
    %c0_i32_1 = arith.constant 0 : i32
    return %c0_i32, %c0_i32_0 : i32, i32
  }
  func.func @transform_8(%arg0: i32) -> (i32, i32) {
    %c0_i32 = arith.constant 0 : i32
    %c0_i32_0 = arith.constant 0 : i32
    %c0_i32_1 = arith.constant 0 : i32
    return %c0_i32, %c0_i32_0 : i32, i32
  }
  func.func @transform_9(%arg0: i32) -> (i32, i32) {
    %c0_i32 = arith.constant 0 : i32
    %c0_i32_0 = arith.constant 0 : i32
    %c0_i32_1 = arith.constant 0 : i32
    return %c0_i32, %c0_i32_0 : i32, i32
  }
  func.func @transform_10(%arg0: i32) -> (i32, i32) {
    %c0_i32 = arith.constant 0 : i32
    %c0_i32_0 = arith.constant 0 : i32
    %c0_i32_1 = arith.constant 0 : i32
    return %c0_i32, %c0_i32_0 : i32, i32
  }
  func.func @transform_11(%arg0: i32) -> (i32, i32) {
    %c0_i32 = arith.constant 0 : i32
    %c0_i32_0 = arith.constant 0 : i32
    return %arg0, %c0_i32 : i32, i32
  }
}

</mosaic_0001>

<bundles_post_ra>
// kernel: video_recommender_forward.1
= control target key start
LH: loop header
LB: loop body
LE: loop exit
PB: predicated region body
PF: predicated region fallthrough
CT: control target
= control target key end

     0   :  { %v845_v1 = vmov 0   ;;  %v846_v51 = vmov 0.0   ;;  %v319_v58 = vlaneseq  ;;  %vm847_vm0 = vmmov 0   ;;  %s1100_s3 = inlined_call_operand.vmem [shape: bf16[128,256], index: 3, kind: input, shape index: {}]   ;;  %s1101_s2 = inlined_call_operand.vmem [shape: bf16[128,256], index: 2, kind: input, shape index: {}]   ;;  %s1102_s5 = inlined_call_operand.vmem [shape: bf16[256,128], index: 5, kind: input, shape index: {}]   ;;  %s1103_s1 = inlined_call_operand.vmem [shape: bf16[8,128], index: 1, kind: input, shape index: {}]   ;;  %s1104_s0 = inlined_call_operand.vmem [shape: bf16[8,128], index: 0, kind: input, shape index: {}]   ;;  %s1105_s7 = inlined_call_operand.vmem [shape: bf16[128,128], index: 7, kind: input, shape index: {}]   ;;  %s1106_s4 = inlined_call_operand.vmem [shape: f32[1,256], index: 4, kind: input, shape index: {}]   ;;  %s1107_s6 = inlined_call_operand.vmem [shape: f32[1,128], index: 6, kind: input, shape index: {}]   ;;  %s1108_s10 = inlined_call_operand.<no memory space> [shape: f32[1,1], index: 10, kind: input, shape index: {}]   ;;  %s1109_s8 = inlined_call_operand.vmem [shape: f32[1,128], index: 8, kind: input, shape index: {}]   ;;  %s1110_s9 = inlined_call_operand.vmem [shape: f32[1,128], index: 9, kind: input, shape index: {}]   ;;  %s1111_s11 = inlined_call_operand.vmem [shape: f32[8,1], index: 11, kind: output, shape index: {}]  }
   0x1   :  { %v769_v0 = vld [vmem:[%s1100_s3 + $0x4] ss:$8 sps:$4 sm:$0xff]   ;;  %187 = vmatprep.mubr.bf16.mxu0 %v845_v1  ;;  %308 = vmatprep.mubr.bf16.mxu1 %v845_v1  ;;  %v773_v3 = vld [vmem:[%s1100_s3] ss:$8 sps:$4 sm:$0xff]   ;;  %v775_v5 = vld [vmem:[%s1100_s3 + $0x14] ss:$8 sps:$4 sm:$0xff]  }
   0x2   :  { %v771_v2 = vld [vmem:[%s1101_s2 + $0x4] ss:$8 sps:$4 sm:$0xff]   ;;  %155 = vmatprep.subr.bf16.mxu0 %v769_v0  ;;  %v774_v4 = vld [vmem:[%s1101_s2] ss:$8 sps:$4 sm:$0xff]   ;;  %v777_v6 = vld [vmem:[%s1101_s2 + $0x14] ss:$8 sps:$4 sm:$0xff]  }
   0x3   :  { %276 = vmatprep.subr.bf16.mxu1 %v771_v2  ;;  %156 = vmatpush1.bf16.msra.mxu0 %v773_v3  ;;  %v779_v7 = vld [vmem:[%s1100_s3 + $0x10] ss:$8 sps:$4 sm:$0xff]   ;;  %v781_v9 = vld [vmem:[%s1100_s3 + $0x24] ss:$8 sps:$4 sm:$0xff]   ;;  %v785_v11 = vld [vmem:[%s1100_s3 + $0x20] ss:$8 sps:$4 sm:$0xff]  }
   0x4   :  { %277 = vmatpush1.bf16.msra.mxu1 %v774_v4  ;;  %157 = vmatprep.subr.bf16.mxu0 %v775_v5  ;;  %v780_v8 = vld [vmem:[%s1101_s2 + $0x10] ss:$8 sps:$4 sm:$0xff]   ;;  %v783_v10 = vld [vmem:[%s1101_s2 + $0x24] ss:$8 sps:$4 sm:$0xff]   ;;  %v786_v12 = vld [vmem:[%s1101_s2 + $0x20] ss:$8 sps:$4 sm:$0xff]  }
   0x5   :  { %278 = vmatprep.subr.bf16.mxu1 %v777_v6  ;;  %v787_v13 = vld [vmem:[%s1100_s3 + $0x34] ss:$8 sps:$4 sm:$0xff]   ;;  %v791_v15 = vld [vmem:[%s1100_s3 + $0x30] ss:$8 sps:$4 sm:$0xff]   ;;  %v793_v17 = vld [vmem:[%s1100_s3 + $0x44] ss:$8 sps:$4 sm:$0xff]  }
   0x6   :  { %v789_v14 = vld [vmem:[%s1101_s2 + $0x34] ss:$8 sps:$4 sm:$0xff]   ;;  %v792_v16 = vld [vmem:[%s1101_s2 + $0x30] ss:$8 sps:$4 sm:$0xff]   ;;  %v795_v18 = vld [vmem:[%s1101_s2 + $0x44] ss:$8 sps:$4 sm:$0xff]  }
   0x7   :  { %158 = vmatpush1.bf16.msra.mxu0 %v779_v7  ;;  %v797_v19 = vld [vmem:[%s1100_s3 + $0x40] ss:$8 sps:$4 sm:$0xff]   ;;  %v799_v21 = vld [vmem:[%s1100_s3 + $0x54] ss:$8 sps:$4 sm:$0xff]   ;;  %v803_v23 = vld [vmem:[%s1100_s3 + $0x50] ss:$8 sps:$4 sm:$0xff]  }
   0x8   :  { %279 = vmatpush1.bf16.msra.mxu1 %v780_v8  ;;  %159 = vmatprep.subr.bf16.mxu0 %v781_v9  ;;  %v798_v20 = vld [vmem:[%s1101_s2 + $0x40] ss:$8 sps:$4 sm:$0xff]   ;;  %v801_v22 = vld [vmem:[%s1101_s2 + $0x54] ss:$8 sps:$4 sm:$0xff]   ;;  %v804_v24 = vld [vmem:[%s1101_s2 + $0x50] ss:$8 sps:$4 sm:$0xff]  }
   0x9   :  { %280 = vmatprep.subr.bf16.mxu1 %v783_v10  ;;  %v805_v25 = vld [vmem:[%s1100_s3 + $0x64] ss:$8 sps:$4 sm:$0xff]   ;;  %v809_v27 = vld [vmem:[%s1100_s3 + $0x60] ss:$8 sps:$4 sm:$0xff]   ;;  %v811_v29 = vld [vmem:[%s1100_s3 + $0x74] ss:$8 sps:$4 sm:$0xff]  }
   0xa   :  { %v807_v26 = vld [vmem:[%s1101_s2 + $0x64] ss:$8 sps:$4 sm:$0xff]   ;;  %v810_v28 = vld [vmem:[%s1101_s2 + $0x60] ss:$8 sps:$4 sm:$0xff]   ;;  %v813_v30 = vld [vmem:[%s1101_s2 + $0x74] ss:$8 sps:$4 sm:$0xff]  }
   0xb   :  { %160 = vmatpush1.bf16.msra.mxu0 %v785_v11  ;;  %v815_v31 = vld [vmem:[%s1100_s3 + $0x70] ss:$8 sps:$4 sm:$0xff]   ;;  %v817_v33 = vld [vmem:[%s1102_s5 + $0x40] sm:$0xff]   ;;  %v819_v37 = vld [vmem:[%s1102_s5 + $0x48] sm:$0xff]   ;;  %v320_v59 = vshrl.u32 %v319_v58, 7  ;;  %vm648_vm1 = vcmask 7168  }
   0xc   :  { %281 = vmatpush1.bf16.msra.mxu1 %v786_v12  ;;  %161 = vmatprep.subr.bf16.mxu0 %v787_v13  ;;  %v816_v32 = vld [vmem:[%s1101_s2 + $0x70] ss:$8 sps:$4 sm:$0xff]   ;;  %v58_v34 = vld [vmem:[%s1103_s1] sm:$0xf]  ;;  %v820_v38 = vld [vmem:[%s1102_s5 + $0x8] sm:$0xff]  }
   0xd   :  { %282 = vmatprep.subr.bf16.mxu1 %v789_v14  ;;  %v41_v35 = vld [vmem:[%s1104_s0] sm:$0xf]  ;;  %v821_v39 = vld [vmem:[%s1102_s5 + $0x50] sm:$0xff]   ;;  %v823_v41 = vld [vmem:[%s1102_s5 + $0x58] sm:$0xff]   ;;  %v321_v60 = vsub.s32 0, %v320_v59  ;;  %v325_v62 = vsub.s32 1, %v320_v59 }
   0xe   :  { %v818_v36 = vld [vmem:[%s1102_s5] sm:$0xff]   ;;  %v822_v40 = vld [vmem:[%s1102_s5 + $0x10] sm:$0xff]   ;;  %v824_v42 = vld [vmem:[%s1102_s5 + $0x18] sm:$0xff]  }
   0xf   :  { %162 = vmatpush1.bf16.msra.mxu0 %v791_v15  ;;  %v825_v43 = vld [vmem:[%s1102_s5 + $0x60] sm:$0xff]   ;;  %v827_v45 = vld [vmem:[%s1102_s5 + $0x68] sm:$0xff]   ;;  %v829_v47 = vld [vmem:[%s1102_s5 + $0x70] sm:$0xff]  }
  0x10   :  { %283 = vmatpush1.bf16.msra.mxu1 %v792_v16  ;;  %163 = vmatprep.subr.bf16.mxu0 %v793_v17  ;;  %v826_v44 = vld [vmem:[%s1102_s5 + $0x20] sm:$0xff]   ;;  %v828_v46 = vld [vmem:[%s1102_s5 + $0x28] sm:$0xff]   ;;  %v830_v48 = vld [vmem:[%s1102_s5 + $0x30] sm:$0xff]  }
  0x11   :  { %284 = vmatprep.subr.bf16.mxu1 %v795_v18  ;;  %v831_v49 = vld [vmem:[%s1102_s5 + $0x78] sm:$0xff]   ;;  %v833_v52 = vld [vmem:[%s1105_s7] sm:$0xff]   ;;  %v834_v53 = vld [vmem:[%s1105_s7 + $0x8] sm:$0xff]  }
  0x12   :  { %v832_v50 = vld [vmem:[%s1102_s5 + $0x38] sm:$0xff]   ;;  %v835_v54 = vld [vmem:[%s1105_s7 + $0x10] sm:$0xff]   ;;  %v837_v56 = vld [vmem:[%s1105_s7 + $0x20] sm:$0xff]  }
  0x13   :  { %164 = vmatpush1.bf16.msra.mxu0 %v797_v19  ;;  %v836_v55 = vld [vmem:[%s1105_s7 + $0x18] sm:$0xff]   ;;  %v838_v57 = vld [vmem:[%s1105_s7 + $0x28] sm:$0xff]   ;;  %v317_v61 = vld [vmem:[%s1106_s4] sm:$0x3] }
  0x14   :  { %285 = vmatpush1.bf16.msra.mxu1 %v798_v20  ;;  %165 = vmatprep.subr.bf16.mxu0 %v799_v21  ;;  %v322_v63 = vrot.slane %v317_v61, %v321_v60  ;;  %v326_v2 = vrot.slane %v317_v61, %v325_v62  ;;  %v839_v17 = vld [vmem:[%s1105_s7 + $0x30] sm:$0xff]   ;;  %v840_v18 = vld [vmem:[%s1105_s7 + $0x38] sm:$0xff]   ;;  %v686_v20 = vld [vmem:[%s1107_s6] ss:$0 sm:$0xff] }
  0x15   :  { %286 = vmatprep.subr.bf16.mxu1 %v801_v22 }
  0x17   :  { %166 = vmatpush1.bf16.msra.mxu0 %v803_v23 }
  0x18   :  { %287 = vmatpush1.bf16.msra.mxu1 %v804_v24  ;;  %167 = vmatprep.subr.bf16.mxu0 %v805_v25 }
  0x19   :  { %288 = vmatprep.subr.bf16.mxu1 %v807_v26 }
  0x1b   :  { %168 = vmatpush1.bf16.msra.mxu0 %v809_v27 }
  0x1c   :  { %289 = vmatpush1.bf16.msra.mxu1 %v810_v28  ;;  %169 = vmatprep.subr.bf16.mxu0 %v811_v29  ;;  %v16_v28 = vstv %s1108_s10  ;;  %v703_v29 = vld [vmem:[%s1109_s8] ss:$0 sm:$0xff] }
  0x1d   :  { %290 = vmatprep.subr.bf16.mxu1 %v813_v30  ;;  %17 = vst [vmem:[#allocation2] sm:$0x1] %v16_v28 }
  0x1f   :  { %170 = vmatpush1.bf16.msra.mxu0 %v815_v31 }
  0x20   :  { %291 = vmatpush1.bf16.msra.mxu1 %v816_v32  ;;  %715 = vmatprep.subr.bf16.mxu0 %v817_v33 }
  0x21   :  { %746 = vmatprep.subr.bf16.mxu1 %v846_v51 }
  0x22   :  { %188 = vmatmul.mubr.bf16.vlgmr.msra.gmra.mrb[0].mxu0 %v58_v34  ;;  %v712_v34 = vld [vmem:[%s1110_s9] ss:$0 sm:$0xff] }
  0x23   :  { %309 = vmatmul.mubr.bf16.vlgmr.msra.gmra.mrb[0].mxu1 %v41_v35  ;;  %716 = vmatpush3.bf16.msra.mxu0 %v818_v36 }
  0x24   :  { %717 = vmatprep.subr.bf16.mxu0 %v819_v37  ;;  %747 = vmatpush3.bf16.msra.mxu1 %v833_v52 }
  0x25   :  { %748 = vmatprep.subr.bf16.mxu1 %v846_v51  ;;  %762 = vmatprep.mubr.msk.bf16.mxu1 %vm847_vm0, %v846_v51 }
  0x27   :  { %718 = vmatpush3.bf16.msra.mxu0 %v820_v38  ;;  %v713_v38 = vld [vmem:[#allocation2] ss:$0 sm:$0xff] }
  0x28   :  { %719 = vmatprep.subr.bf16.mxu0 %v821_v39  ;;  %749 = vmatpush3.bf16.msra.mxu1 %v834_v53 }
  0x29   :  { %750 = vmatprep.subr.bf16.mxu1 %v846_v51 }
  0x2b   :  { %720 = vmatpush3.bf16.msra.mxu0 %v822_v40 }
  0x2c   :  { %721 = vmatprep.subr.bf16.mxu0 %v823_v41  ;;  %751 = vmatpush3.bf16.msra.mxu1 %v835_v54 }
  0x2d   :  { %752 = vmatprep.subr.bf16.mxu1 %v846_v51 }
  0x2f   :  { %722 = vmatpush3.bf16.msra.mxu0 %v824_v42 }
  0x30   :  { %723 = vmatprep.subr.bf16.mxu0 %v825_v43  ;;  %753 = vmatpush3.bf16.msra.mxu1 %v836_v55 }
  0x31   :  { %754 = vmatprep.subr.bf16.mxu1 %v846_v51 }
  0x33   :  { %724 = vmatpush3.bf16.msra.mxu0 %v826_v44 }
  0x34   :  { %725 = vmatprep.subr.bf16.mxu0 %v827_v45  ;;  %755 = vmatpush3.bf16.msra.mxu1 %v837_v56 }
  0x35   :  { %756 = vmatprep.subr.bf16.mxu1 %v846_v51 }
  0x37   :  { %726 = vmatpush3.bf16.msra.mxu0 %v828_v46 }
  0x38   :  { %727 = vmatprep.subr.bf16.mxu0 %v829_v47  ;;  %757 = vmatpush3.bf16.msra.mxu1 %v838_v57 }
  0x39   :  { %758 = vmatprep.subr.bf16.mxu1 %v846_v51 }
  0x3b   :  { %728 = vmatpush3.bf16.msra.mxu0 %v830_v48 }
  0x3c   :  { %729 = vmatprep.subr.bf16.mxu0 %v831_v49  ;;  %759 = vmatpush3.bf16.msra.mxu1 %v839_v17 }
  0x3d   :  { %760 = vmatprep.subr.bf16.mxu1 %v846_v51 }
  0x3f   :  { %730 = vmatpush3.bf16.msra.mxu0 %v832_v50 }
  0x40   :  { %761 = vmatpush3.bf16.msra.mxu1 %v840_v18 }
  0xf5   :  { %v189_v0 = vpop.f32.mrb[0].mxu0 }
  0xf6   :  { %v310_v1 = vpop.f32.mrb[0].mxu1  ;;  %v191_v4 = vpop.f32.mrb[1].mxu0 }
  0xf7   :  { %v311_v3 = vadd.f32 %v310_v1, %v189_v0  ;;  %v312_v5 = vpop.f32.mrb[1].mxu1  ;;  %v193_v7 = vpop.f32.mrb[2].mxu0 }
  0xf8   :  { %v313_v6 = vadd.f32 %v312_v5, %v191_v4  ;;  %v314_v8 = vpop.f32.mrb[2].mxu1  ;;  %v194_v10 = vpop.f32.mrb[3].mxu0 }
  0xf9   :  { %v329_v9 = vadd.f32 %v322_v63, %v311_v3  ;;  %v315_v11 = vpop.f32.mrb[3].mxu1 }
  0xfa   :  { %v330_v12 = vadd.f32 %v326_v2, %v313_v6 }
  0xfb   :  { %v331_v13 = vmax.f32 %v329_v9, 0.0 }
  0xfc   :  { %v332_v14 = vmax.f32 %v330_v12, 0.0 }
  0xfd   :  { %v333_v16 = vpack.c.bf16 %v331_v13, %v331_v13 }
  0xfe   :  { %v334_v15 = vpack.c.bf16 %v332_v14, %v332_v14 }
 0x100   :  { %502 = vmatprep.mubr.bf16.mxu0 %v334_v15 }
 0x101   :  { %503 = vmatmul.mubr.bf16.vlgmr.msra.gmra.mrb[4].mxu0 %v333_v16 }
 0x1d4   :  { %v731_v19 = vpop.f32.mrb[4].mxu0 }
 0x1d5   :  { %v732_v21 = vpop.f32.mrb[5].mxu0 }
 0x1d6   :  { %v733_v22 = vadd.f32 %v732_v21, %v731_v19  ;;  %v734_v23 = vpop.f32.mrb[6].mxu0 }
 0x1d7   :  { %v735_v24 = vpop.f32.mrb[7].mxu0 }
 0x1d8   :  { %v505_v25 = vadd.f32 %v733_v22, %v686_v20 }
 0x1da   :  { %v510_v26 = vmax.f32 %v505_v25, 0.0 }
 0x1dc   :  { %v511_v27 = vpack.c.bf16 %v510_v26, %v510_v26 }
 0x1de   :  { %763 = vmatmul.mubr.bf16.vlgmr.msra.gmra.mrb[4].mxu1 %v511_v27 }
 0x2b1   :  { %v617_v30 = vpop.f32.mrb[4].mxu1 }
 0x2b2   :  { %v618_v31 = vadd.f32 %v703_v29, %v617_v30  ;;  %v764_v32 = vpop.f32.mrb[5].mxu1 }
 0x2b3   :  { %v620_v33 = vpop.f32.mrb[6].mxu1 }
 0x2b4   :  { %v623_v35 = vmax.f32 %v618_v31, 0.0  ;;  %v765_v36 = vpop.f32.mrb[7].mxu1 }
 0x2b6   :  { %v631_v37 = vmul.f32 %v712_v34, %v623_v35 }
 0x2b8   :  { %632 = vadd.xlane.f32.xlu0 %v631_v37 }
 0x345   :  { %v633_v39 = vpop.xlane.xlu0 %632 }
 0x346   :  { %v641_v40 = vadd.f32 %v713_v38, %v633_v39 }
 0x348   :  { %v714_v41 = vmul.f32 -1.442695, %v641_v40 }
 0x34a   :  { %841 = vpow2.f32 %v714_v41 }
 0x354   :  { %v842_v42 = vpop.eup %841 }
 0x355   :  { %v645_v43 = vadd.f32 1.0, %v842_v42 }
 0x357   :  { %843 = vrcp.f32 %v645_v43 }
 0x361   :  { %v844_v44 = vpop.eup %843 }
 0x362   :  { %649 = vst.msk [vmem:[%s1111_s11] sm:$0xff] %vm648_vm1, %v844_v44 }

</bundles_post_ra>
